<compile_context>
chip_gen: v5e
topology: v5e:2x2
jax: 0.10.0
libtpu: 0.0.40
codegen_flags: <defaults>
</compile_context>

<pallas_src>
import functools

import jax
import jax.numpy as jnp
from jax.experimental import pallas as pl
from jax.experimental.pallas import tpu as pltpu

_LANES = 128
# 1024 rows * 128 lanes: 512 KiB per f32 input buffer (x2 double-buffered) and
# 128 KiB per 1-byte output buffer -> far under VMEM limits on all chips, and
# a multiple of 32 rows so the 1-byte output tile stores unmasked & lane-dense.
_MAX_BLOCK_ROWS = 1024

_OPS = {
    "equal": lambda a, s: a == s,
    "greaterEqual": lambda a, s: a >= s,
    "greaterThan": lambda a, s: a > s,
    "lessEqual": lambda a, s: a <= s,
    "lessThan": lambda a, s: a < s,
    "notEqual": lambda a, s: a != s,
}


def _cmp_kernel(rhs_ref, a_ref, o_ref, *, op_type, cmp_dtype):
    # rhs_ref: (1,) scalar in SMEM; splat onto the VPU is free.
    a = a_ref[...].astype(cmp_dtype)
    rhs = rhs_ref[0].astype(cmp_dtype)
    o_ref[...] = _OPS[op_type](a, rhs).astype(o_ref.dtype)


@functools.lru_cache(maxsize=None)
def _bool_io_supported() -> bool:
    """One-time probe: can this Pallas/Mosaic build store bool outputs?"""
    try:
        x = jnp.arange(8 * _LANES, dtype=jnp.float32).reshape(8, _LANES) - 100.0

        def probe(x_ref, o_ref):
            o_ref[...] = x_ref[...] > 0.0

        got = pl.pallas_call(
            probe, out_shape=jax.ShapeDtypeStruct((8, _LANES), jnp.bool_)
        )(x)
        return bool(jnp.array_equal(got, x > 0.0))
    except Exception:
        return False


def scalar_vector_cmp(a: jax.Array, op_type: str, rhs_scalar) -> jax.Array:
    """Elementwise `a <op> rhs_scalar` -> bool tensor, same shape as `a`."""
    if op_type not in _OPS:
        raise ValueError(f"unsupported opType: {op_type}")

    orig_shape = a.shape
    n = a.size
    if n == 0:
        return jnp.zeros(orig_shape, dtype=jnp.bool_)

    # PyTorch-style promotion: weak python scalars keep the tensor dtype,
    # except an int tensor vs a python float scalar -> compare in float32.
    cmp_dtype = jnp.result_type(a.dtype, rhs_scalar)
    smem_dtype = jnp.float32 if jnp.issubdtype(cmp_dtype, jnp.floating) else jnp.int32
    rhs_arr = jnp.asarray([rhs_scalar], dtype=smem_dtype)

    # Lane-dense 2D view: last dim -> 128 lanes, rows -> sublanes. The reshape
    # of a contiguous array is free; pad only if n isn't a multiple of 128.
    flat = a.reshape(-1)
    pad = (-n) % _LANES
    if pad:
        flat = jnp.pad(flat, (0, pad))
    rows = flat.shape[0] // _LANES
    a2d = flat.reshape(rows, _LANES)

    # Full-array block for small inputs, otherwise large 32-aligned row blocks;
    # a partial trailing block is handled by Pallas boundary masking.
    block_rows = rows if rows <= _MAX_BLOCK_ROWS else _MAX_BLOCK_ROWS
    grid = (pl.cdiv(rows, block_rows),)

    out_dtype = jnp.bool_ if _bool_io_supported() else jnp.uint8

    kernel = functools.partial(_cmp_kernel, op_type=op_type, cmp_dtype=cmp_dtype)
    out2d = pl.pallas_call(
        kernel,
        out_shape=jax.ShapeDtypeStruct((rows, _LANES), out_dtype),
        grid_spec=pltpu.PrefetchScalarGridSpec(
            num_scalar_prefetch=0,
            grid=grid,
            in_specs=[
                pl.BlockSpec(memory_space=pltpu.MemorySpace.SMEM),  # rhs scalar
                pl.BlockSpec((block_rows, _LANES), lambda i: (i, 0)),
            ],
            out_specs=pl.BlockSpec((block_rows, _LANES), lambda i: (i, 0)),
        ),
        compiler_params=pltpu.CompilerParams(
            dimension_semantics=("parallel",),
        ),
    )(rhs_arr, a2d)

    if pad:
        out = out2d.reshape(-1)[:n].reshape(orig_shape)
    else:
        out = out2d.reshape(orig_shape)
    if out.dtype != jnp.bool_:
        out = out.astype(jnp.bool_)  # fallback path only (uint8 storage)
    return out


if __name__ == "__main__":
    key = jax.random.PRNGKey(0)
    # Small NCHW-like tensor, consistent with how the test module is exercised.
    x = jax.random.normal(key, (2, 4, 16, 16), dtype=jnp.float32)
    rhs = 0.1

    refs = {
        "equal": x == rhs,
        "greaterEqual": x >= rhs,
        "greaterThan": x > rhs,
        "lessEqual": x <= rhs,
        "lessThan": x < rhs,
        "notEqual": x != rhs,
    }
    for op in ("equal", "greaterEqual", "greaterThan",
               "lessEqual", "lessThan", "notEqual"):
        got = jax.block_until_ready(scalar_vector_cmp(x, op, rhs))
        assert got.dtype == jnp.bool_, (op, got.dtype)
        assert got.shape == x.shape
        assert bool(jnp.array_equal(got, refs[op])), f"mismatch for {op}"

    # Integer tensor vs float scalar: must compare in the promoted (float) dtype.
    xi = jax.random.randint(jax.random.PRNGKey(1), (2, 4, 16, 16), -3, 3,
                            dtype=jnp.int32)
    got_i = jax.block_until_ready(scalar_vector_cmp(xi, "greaterThan", 0.5))
    assert bool(jnp.array_equal(got_i, xi.astype(jnp.float32) > 0.5))

    # Shape whose element count is not a multiple of 128 (exercises pad path).
    xo = jax.random.normal(jax.random.PRNGKey(2), (3, 5, 7), dtype=jnp.float32)
    got_o = jax.block_until_ready(scalar_vector_cmp(xo, "lessEqual", rhs))
    assert bool(jnp.array_equal(got_o, xo <= rhs))

    print("KERNEL_OK")
</pallas_src>

<mosaic_0001>
module attributes {stable_mosaic.version = 11 : i64} {
  func.func @probe(%arg0: memref<8x128xf32, #tpu.memory_space<vmem>>, %arg1: memref<8x128xi32, #tpu.memory_space<vmem>>) attributes {dimension_semantics = [], scalar_prefetch = 0 : i64, scratch_operands = 0 : i64, tpu.core_type = #tpu.core_type<tc>} {
    %c0 = arith.constant 0 : index
    %c0_0 = arith.constant 0 : index
    %0 = vector.load %arg0[%c0, %c0_0] : memref<8x128xf32, #tpu.memory_space<vmem>>, vector<8x128xf32>
    %cst = arith.constant 0.000000e+00 : f32
    %1 = vector.broadcast %cst : f32 to vector<8x128xf32>
    %2 = arith.cmpf ogt, %0, %1 : vector<8x128xf32>
    %c0_1 = arith.constant 0 : index
    %c0_2 = arith.constant 0 : index
    %3 = vector.load %arg1[%c0_1, %c0_2] : memref<8x128xi32, #tpu.memory_space<vmem>>, vector<8x128xi32>
    %4 = arith.extui %2 : vector<8x128xi1> to vector<8x128xi32>
    %cst_3 = arith.constant dense<0> : vector<8x128xi32>
    %5 = arith.cmpi ne, %3, %cst_3 : vector<8x128xi32>
    tpu.vector_store %arg1[%c0_1, %c0_2], %4 {strides = array<i32>} : memref<8x128xi32, #tpu.memory_space<vmem>>, vector<8x128xi32>,
    return
  }
}

module attributes {stable_mosaic.version = 11 : i64} {
  func.func @_cmp_kernel(%arg0: i32, %arg1: memref<1xf32, #tpu.memory_space<smem>>, %arg2: memref<16x128xf32, #tpu.memory_space<vmem>>, %arg3: memref<16x128xi8, #tpu.memory_space<vmem>>) attributes {dimension_semantics = [#tpu.dimension_semantics<parallel>], iteration_bounds = array<i64: 1>, scalar_prefetch = 0 : i64, scratch_operands = 0 : i64, tpu.core_type = #tpu.core_type<tc>, window_params = [{transform_indices = @transform_0, window_bounds = array<i64: 1>}, {transform_indices = @transform_1, window_bounds = array<i64: 16, 128>}, {transform_indices = @transform_2, window_bounds = array<i64: 16, 128>}]} {
    %c0 = arith.constant 0 : index
    %c0_0 = arith.constant 0 : index
    %0 = vector.load %arg2[%c0, %c0_0] : memref<16x128xf32, #tpu.memory_space<vmem>>, vector<16x128xf32>
    %c0_1 = arith.constant 0 : index
    %1 = memref.load %arg1[%c0_1] : memref<1xf32, #tpu.memory_space<smem>>
    %2 = vector.broadcast %1 : f32 to vector<16x128xf32>
    %3 = arith.cmpf oeq, %0, %2 : vector<16x128xf32>
    %4 = arith.extui %3 : vector<16x128xi1> to vector<16x128xi8>
    %c0_2 = arith.constant 0 : index
    %c0_3 = arith.constant 0 : index
    %5 = vector.load %arg3[%c0_2, %c0_3] : memref<16x128xi8, #tpu.memory_space<vmem>>, vector<16x128xi8>
    tpu.vector_store %arg3[%c0_2, %c0_3], %4 {strides = array<i32>} : memref<16x128xi8, #tpu.memory_space<vmem>>, vector<16x128xi8>,
    return
  }
  func.func @transform_0(%arg0: i32) -> i32 {
    %c0_i32 = arith.constant 0 : i32
    %c0_i32_0 = arith.constant 0 : i32
    return %c0_i32 : i32
  }
  func.func @transform_1(%arg0: i32) -> (i32, i32) {
    %c0_i32 = arith.constant 0 : i32
    %c0_i32_0 = arith.constant 0 : i32
    return %arg0, %c0_i32 : i32, i32
  }
  func.func @transform_2(%arg0: i32) -> (i32, i32) {
    %c0_i32 = arith.constant 0 : i32
    %c0_i32_0 = arith.constant 0 : i32
    return %arg0, %c0_i32 : i32, i32
  }
}

</mosaic_0001>

<bundles_post_ra>
// kernel: tpu_custom_call.1
= control target key start
LH: loop header
LB: loop body
LE: loop exit
PB: predicated region body
PF: predicated region fallthrough
CT: control target
= control target key end

     0   :  { %6 = vsyncpa [#allocation3], 0  ;;  %s59_s9 = smov [#allocation2]   ;;  %s77_s0 = inlined_call_operand.hbm [shape: f32[8,128], index: 0, kind: input, shape index: {}]   ;;  %s78_s1 = inlined_call_operand.vmem [shape: s32[8,128], index: 1, kind: output, shape index: {}]  }
   0x1   :  { %s12_s8 = sshll.u32 %s77_s0, 4  ;;  %s14_s10 = sshll.u32 %s59_s9, 4  ;;  %s13_s8 = int_to_ptr.hbm [resolvable:$true] %s12_s8  ;;  %s15_s10 = int_to_ptr.vmem [resolvable:$true] %s14_s10 }
   0x2   :  { %17 = dma.hbm_to_vmem [thread:$0]  %s13_s8, 128, %s15_s10, [#allocation3]  }
   0x3   :  { %57 = dma.done.wait [#allocation3], 128  }
   0x4   :  { %58 = vsyncadd [#allocation3], 4294967168  ;;  %v22_v0 = vld [vmem:[#allocation2] sm:$0xff]  ;;  %v60_v1 = vmov 0  }
   0x5   :  { %vm23_vm0 = vcmp.gt.f32.partialorder %v22_v0, 0.0 }
   0x6   :  { %v24_v2 = vsel %vm23_vm0, 1, %v60_v1 }
   0x7   :  { %25 = vst [vmem:[%s78_s1] sm:$0xff] %v24_v2 }
   0x8   :  { %30 = vsyncpa [#allocation3], 1 }

// kernel: tpu_custom_call.1
= control target key start
LH: loop header
LB: loop body
LE: loop exit
PB: predicated region body
PF: predicated region fallthrough
CT: control target
= control target key end

     0   :  { %8 = vsyncpa [#allocation4], 0  ;;  %s160_s0 = inlined_call_operand.<no memory space> [shape: f32[1], index: 0, kind: input, shape index: {}]   ;;  %s161_s1 = inlined_call_operand.hbm [shape: f32[16,128], index: 1, kind: input, shape index: {}]   ;;  %s162_s2 = inlined_call_operand.hbm [shape: u8[16,128], index: 2, kind: output, shape index: {}]  }
   0x1   :  { %9 = vsyncpa [#allocation5], 0  ;;  %s16_s11 = sshll.u32 %s161_s1, 4  ;;  %s129_s12 = smov [#allocation3]   ;;  %s17_s11 = int_to_ptr.hbm [resolvable:$true] %s16_s11 }
   0x2   :  { %s18_s13 = sshll.u32 %s129_s12, 4  ;;  %s130_s14 = smov 128   ;;  %s19_s13 = int_to_ptr.vmem [resolvable:$true] %s18_s13 }
   0x3   :  { %s131_s15 = smov 8  }
   0x4   :  { %24 = dma.hbm_to_vmem [thread:$0]  %s17_s11, 256, %s19_s13, [#allocation4], %s130_s14, %s130_s14, %s131_s15  }
   0x5   :  { %125 = dma.done.wait [#allocation4], 256  }
   0x6   :  { %126 = vsyncadd [#allocation4], 4294967040  ;;  %v34_v0 = vstv %s160_s0  ;;  %v31_v1 = vld [vmem:[#allocation3] sm:$0xff]  ;;  %v32_v2 = vld [vmem:[#allocation3 + $0x8] sm:$0xff]  ;;  %v132_v3 = vmov 0   ;;  %s133_s1 = smov [#allocation6]  }
   0x7   :  { %vm35_vm0 = vcmp.eq.f32.partialorder %v31_v1, %v34_v0  ;;  %vm36_vm1 = vcmp.eq.f32.partialorder %v32_v2, %v34_v0  ;;  %s55_s18 = sshll.u32 %s133_s1, 4  ;;  %s57_s21 = sshll.u32 %s162_s2, 4  ;;  %s56_s18 = int_to_ptr.vmem [resolvable:$true] %s55_s18  ;;  %s58_s21 = int_to_ptr.hbm [resolvable:$true] %s57_s21 }
   0x8   :  { %vm37_vm2 = vmpackc.low %vm36_vm1, %vm35_vm0  ;;  %s134_s0 = smov 32   ;;  %s135_s22 = smov 2  }
   0x9   :  { %v38_v4 = vsel %vm37_vm2, 16711935, %v132_v3 }
   0xa   :  { %v40_v5 = vpack.c.b8 %v38_v4, %v38_v4 }
   0xc   :  { %vm41_vm3 = vnez %v40_v5 }
   0xd   :  { %v42_v6 = vsel %vm41_vm3, 16843009, %v132_v3 }
   0xe   :  { %v43_v7 = vunpack.c.0.s8 %v42_v6  ;;  %v44_v8 = vunpack.c.1.s8 %v42_v6 }
  0x10   :  { %v45_v9 = vpack.c.b16 %v43_v7, %v43_v7  ;;  %v47_v10 = vpack.c.b16 %v44_v8, %v44_v8 }
  0x12   :  { %v46_v11 = vpack.c.b8 %v45_v9, %v45_v9  ;;  %v48_v12 = vpack.c.b8 %v47_v10, %v47_v10 }
  0x14   :  { %49 = vst [vmem:[#allocation6] sm:$0x3] %v46_v11 }
  0x15   :  { %50 = vst [vmem:[#allocation6 + $0x2] sm:$0x3] %v48_v12 }
  0x16   :  { %63 = dma.vmem_to_hbm [thread:$0]  %s56_s18, 64, %s58_s21, [#allocation5], %s134_s0, %s134_s0, %s135_s22  }
  0x17   :  { %127 = dma.done.wait [#allocation5], 64  }
  0x18   :  { %128 = vsyncadd [#allocation5], 4294967232 }
  0x19   :  { %68 = vsyncpa [#allocation4], 1 }
  0x1a   :  { %69 = vsyncpa [#allocation5], 1 }

</bundles_post_ra>
